<compile_context>
chip_gen: v7x
topology: tpu7x:2x2x1
jax: 0.10.0
libtpu: 0.0.40
codegen_flags: <defaults>
</compile_context>

<pallas_src>
import functools
import math

import jax
import jax.numpy as jnp
from jax.experimental import pallas as pl
from jax.experimental.pallas import tpu as pltpu


def _as_pair(v):
    if isinstance(v, (int, float)):
        return (v, v)
    v = tuple(v)
    assert len(v) == 2
    return v


def _round_up(v, m):
    return ((v + m - 1) // m) * m


def gaussian_taps_1d(size, sigma):
    """Normalized 1-D Gaussian taps as Python floats (compile-time constants)."""
    size = int(size)
    sigma = float(sigma)
    mean = (size - 1) / 2.0
    taps = [math.exp(-(((i - mean) / sigma) ** 2) / 2.0) for i in range(size)]
    s = sum(taps)
    return tuple(t / s for t in taps)


def _band_matrix(n_in, n_out, taps):
    """(n_in, n_out) matrix M with M[i, o] = taps[i - o] (valid cross-correlation)."""
    k = len(taps)
    i = jnp.arange(n_in, dtype=jnp.int32)[:, None]
    o = jnp.arange(n_out, dtype=jnp.int32)[None, :]
    d = i - o
    t = jnp.asarray(taps, dtype=jnp.float32)
    inside = (d >= 0) & (d < k)
    return jnp.where(inside, t[jnp.clip(d, 0, k - 1)], 0.0).astype(jnp.float32)


def make_gaussian_kernel_2d(channels, kernel_size, sigma):
    """Same 2-D weight construction as the PyTorch module (used for the reference)."""
    ks = _as_pair(kernel_size)
    sg = _as_pair(sigma)
    grids = jnp.meshgrid(*[jnp.arange(int(s), dtype=jnp.float32) for s in ks],
                         indexing="ij")
    kernel = jnp.ones((), dtype=jnp.float32)
    for size, std, mgrid in zip(ks, sg, grids):
        mean = (size - 1) / 2.0
        kernel = kernel * (1.0 / (std * math.sqrt(2.0 * math.pi))
                           * jnp.exp(-(((mgrid - mean) / std) ** 2) / 2.0))
    kernel = kernel / jnp.sum(kernel)
    # PyTorch: view(1,1,K,K).repeat(C,1,1,1) -> (C,1,K,K); we keep (C,Kh,Kw).
    return jnp.broadcast_to(kernel[None, ...], (channels,) + kernel.shape)


def _smooth_kernel(sht_ref, sw_ref, x_ref, o_ref, *, block, unroll):
    # sht_ref: (H_out, H)  constant vertical tap matrix (transposed band)
    # sw_ref : (W, W_out)  constant horizontal tap matrix
    # x_ref  : (B, H, W)   B fused (n, c) slabs
    # o_ref  : (B, H_out, W_out)
    sht = sht_ref[...]
    sw = sw_ref[...]

    def slab(b):
        x = x_ref[b].astype(jnp.float32)                           # (H, W)
        t = jnp.dot(sht, x, preferred_element_type=jnp.float32)    # (H_out, W)   MXU
        y = jnp.dot(t, sw, preferred_element_type=jnp.float32)     # (H_out, W_out) MXU
        o_ref[b] = y.astype(o_ref.dtype)

    if unroll:
        for b in range(block):        # static loop: small slabs, full LLO visibility
            slab(b)
    else:
        @pl.loop(0, block)            # rolled loop: keeps vreg pressure bounded
        def _(b):
            slab(b)


def _vmem_limit_bytes():
    """Per-generation scoped-VMEM limit: ~48 MiB on v7x (64 MiB/TC), ~100 MiB on v5e/v6e."""
    cap = None
    try:
        info = pltpu.get_tpu_info()
        cap = getattr(info, "vmem_capacity_bytes", None)
    except Exception:
        cap = None
    if not cap:
        cap = 64 << 20  # conservative fallback = v7x per-TensorCore VMEM
    limit = min(int(cap) - (16 << 20), 100 << 20)
    return max(32 << 20, limit)


def _padded_slab_bytes(h, w, itemsize):
    # VMEM tiles pad the last two dims (sublane tile is 8 for 32-bit, 16 for packed
    # 16-bit dtypes); be conservative.
    return _round_up(h, 16) * _round_up(w, 128) * itemsize


def _pick_block(nc, in_bytes, out_bytes, budget_bytes, min_steps=4):
    """Largest slab count whose double-buffered in+out footprint fits the budget,
    keeping >= min_steps grid steps (v7x: 2 TCs x 2 pipelined steps) when possible."""
    per_slab = 2 * (in_bytes + out_bytes)     # Pallas double-buffers both streams
    b = max(1, int(budget_bytes) // max(per_slab, 1))
    if nc >= min_steps:
        b = min(b, nc // min_steps)
    return max(1, min(b, nc))


def gaussian_smoothing_2d(x, kernel_size, sigma):
    """Depthwise 'valid' Gaussian smoothing: (N, C, H, W) -> (N, C, H-Kh+1, W-Kw+1).

    Relies on the module's construction: every channel uses the identical, separable
    Gaussian, so the whole filter is baked into two tiny constant banded matrices and
    the depthwise conv becomes  out = S_hT @ x @ S_w  per (n, c) slab (both on the MXU).
    """
    N, C, H, W = x.shape
    kh, kw = (int(k) for k in _as_pair(kernel_size))
    sig_h, sig_w = (float(s) for s in _as_pair(sigma))
    H_out, W_out = H - kh + 1, W - kw + 1
    assert H_out > 0 and W_out > 0

    # Constant banded tap matrices (individually normalized 1-D taps reproduce the
    # jointly-normalized 2-D kernel exactly since it is an outer product).
    s_ht = _band_matrix(H, H_out, gaussian_taps_1d(kh, sig_h)).T   # (H_out, H)
    s_w = _band_matrix(W, W_out, gaussian_taps_1d(kw, sig_w))      # (W, W_out)

    NC = N * C
    x3 = x.reshape(NC, H, W)    # metadata-only collapse of the leading dims

    vmem_limit = _vmem_limit_bytes()
    itemsize = x.dtype.itemsize
    in_bytes = _padded_slab_bytes(H, W, itemsize)
    out_bytes = _padded_slab_bytes(H_out, W_out, itemsize)
    B = _pick_block(NC, in_bytes, out_bytes, vmem_limit // 2)
    grid = (pl.cdiv(NC, B),)    # B need not divide NC; OOB tail is masked by Pallas
    unroll = (B <= 8) and (in_bytes <= 64 * 128 * 4)

    kernel = functools.partial(_smooth_kernel, block=B, unroll=unroll)

    out = pl.pallas_call(
        kernel,
        out_shape=jax.ShapeDtypeStruct((NC, H_out, W_out), x.dtype),
        grid_spec=pltpu.PrefetchScalarGridSpec(
            num_scalar_prefetch=0,
            grid=grid,
            in_specs=[
                pl.BlockSpec((H_out, H), lambda i: (0, 0)),   # constant: DMA'd once
                pl.BlockSpec((W, W_out), lambda i: (0, 0)),   # constant: DMA'd once
                pl.BlockSpec((B, H, W), lambda i: (i, 0, 0)),
            ],
            out_specs=pl.BlockSpec((B, H_out, W_out), lambda i: (i, 0, 0)),
        ),
        compiler_params=pltpu.CompilerParams(
            dimension_semantics=("parallel",),
            vmem_limit_bytes=int(vmem_limit),
        ),
    )(s_ht, s_w, x3)

    return out.reshape(N, C, H_out, W_out)   # metadata-only split of the leading dim


def _depthwise_conv2d_valid_ref(x, w):
    """Pure-JAX f32 reference with F.conv2d(padding=0, groups=C) semantics."""
    N, C, H, W = x.shape
    Kh, Kw = int(w.shape[-2]), int(w.shape[-1])
    Ho, Wo = H - Kh + 1, W - Kw + 1
    out = jnp.zeros((N, C, Ho, Wo), jnp.float32)
    for ki in range(Kh):
        for kj in range(Kw):
            tap = w[:, ki, kj][None, :, None, None]
            out = out + x[:, :, ki:ki + Ho, kj:kj + Wo].astype(jnp.float32) * tap
    return out.astype(x.dtype)


if __name__ == "__main__":
    # Module config: channels=4, kernel_size=5, sigma=1.5, dim=2.
    channels, kernel_size, sigma = 4, 5, 1.5

    key = jax.random.PRNGKey(0)
    x = jax.random.normal(key, (2, channels, 16, 16), dtype=jnp.float32)

    out = gaussian_smoothing_2d(x, kernel_size, sigma)
    out = jax.block_until_ready(out)
    assert out.shape == (2, channels, 12, 12)

    # Cross-check against the exact 2-D weight the PyTorch module registers.
    weight2d = make_gaussian_kernel_2d(channels, kernel_size, sigma)  # (C, K, K)
    ref = _depthwise_conv2d_valid_ref(x, weight2d)
    assert jnp.allclose(out, ref, atol=1e-5, rtol=1e-5), float(
        jnp.max(jnp.abs(out - ref)))

    # TODO(synk): the module's dim=1 / dim=3 (F.conv1d / F.conv3d) paths are not
    # implemented; only the default dim=2 forward is covered here.
    print("KERNEL_OK")
</pallas_src>

<mosaic_0001>
module attributes {stable_mosaic.version = 11 : i64} {
  func.func @_smooth_kernel(%arg0: i32, %arg1: memref<12x16xf32, #tpu.memory_space<vmem>>, %arg2: memref<16x12xf32, #tpu.memory_space<vmem>>, %arg3: memref<2x16x16xf32, #tpu.memory_space<vmem>>, %arg4: memref<2x12x12xf32, #tpu.memory_space<vmem>>) attributes {dimension_semantics = [#tpu.dimension_semantics<parallel>], iteration_bounds = array<i64: 4>, scalar_prefetch = 0 : i64, scratch_operands = 0 : i64, tpu.core_type = #tpu.core_type<tc>, window_params = [{pipeline_mode = #tpu.pipeline_mode<synchronous>, transform_indices = @transform_0, window_bounds = array<i64: 12, 16>}, {pipeline_mode = #tpu.pipeline_mode<synchronous>, transform_indices = @transform_1, window_bounds = array<i64: 16, 12>}, {transform_indices = @transform_2, window_bounds = array<i64: 2, 16, 16>}, {transform_indices = @transform_3, window_bounds = array<i64: 2, 12, 12>}]} {
    %c0 = arith.constant 0 : index
    %c0_0 = arith.constant 0 : index
    %0 = vector.load %arg1[%c0, %c0_0] : memref<12x16xf32, #tpu.memory_space<vmem>>, vector<12x16xf32>
    %c0_1 = arith.constant 0 : index
    %c0_2 = arith.constant 0 : index
    %1 = vector.load %arg2[%c0_1, %c0_2] : memref<16x12xf32, #tpu.memory_space<vmem>>, vector<16x12xf32>
    %c0_3 = arith.constant 0 : index
    %c0_4 = arith.constant 0 : index
    %c0_5 = arith.constant 0 : index
    %2 = vector.load %arg3[%c0_3, %c0_4, %c0_5] : memref<2x16x16xf32, #tpu.memory_space<vmem>>, vector<1x16x16xf32>
    %3 = vector.shape_cast %2 : vector<1x16x16xf32> to vector<16x16xf32>
    %cst = arith.constant dense<0.000000e+00> : vector<12x16xf32>
    %4 = tpu.matmul %0, %3, %cst {dimension_numbers = #tpu.dot_dimension_numbers<[1], [0], [0], [1], [0, 0, 1, 1], [], []>} : vector<12x16xf32>, vector<16x16xf32>, vector<12x16xf32> -> vector<12x16xf32>
    %cst_6 = arith.constant dense<0.000000e+00> : vector<12x12xf32>
    %5 = tpu.matmul %4, %1, %cst_6 {dimension_numbers = #tpu.dot_dimension_numbers<[1], [0], [0], [1], [0, 0, 1, 1], [], []>} : vector<12x16xf32>, vector<16x12xf32>, vector<12x12xf32> -> vector<12x12xf32>
    %c0_7 = arith.constant 0 : index
    %c0_8 = arith.constant 0 : index
    %c0_9 = arith.constant 0 : index
    %6 = vector.load %arg4[%c0_7, %c0_8, %c0_9] : memref<2x12x12xf32, #tpu.memory_space<vmem>>, vector<1x12x12xf32>
    %7 = vector.shape_cast %6 : vector<1x12x12xf32> to vector<12x12xf32>
    %8 = vector.shape_cast %5 : vector<12x12xf32> to vector<1x12x12xf32>
    tpu.vector_store %arg4[%c0_7, %c0_8, %c0_9], %8 {strides = array<i32>} : memref<2x12x12xf32, #tpu.memory_space<vmem>>, vector<1x12x12xf32>,
    %c1 = arith.constant 1 : index
    %c0_10 = arith.constant 0 : index
    %c0_11 = arith.constant 0 : index
    %9 = vector.load %arg3[%c1, %c0_10, %c0_11] : memref<2x16x16xf32, #tpu.memory_space<vmem>>, vector<1x16x16xf32>
    %10 = vector.shape_cast %9 : vector<1x16x16xf32> to vector<16x16xf32>
    %cst_12 = arith.constant dense<0.000000e+00> : vector<12x16xf32>
    %11 = tpu.matmul %0, %10, %cst_12 {dimension_numbers = #tpu.dot_dimension_numbers<[1], [0], [0], [1], [0, 0, 1, 1], [], []>} : vector<12x16xf32>, vector<16x16xf32>, vector<12x16xf32> -> vector<12x16xf32>
    %cst_13 = arith.constant dense<0.000000e+00> : vector<12x12xf32>
    %12 = tpu.matmul %11, %1, %cst_13 {dimension_numbers = #tpu.dot_dimension_numbers<[1], [0], [0], [1], [0, 0, 1, 1], [], []>} : vector<12x16xf32>, vector<16x12xf32>, vector<12x12xf32> -> vector<12x12xf32>
    %c1_14 = arith.constant 1 : index
    %c0_15 = arith.constant 0 : index
    %c0_16 = arith.constant 0 : index
    %13 = vector.load %arg4[%c1_14, %c0_15, %c0_16] : memref<2x12x12xf32, #tpu.memory_space<vmem>>, vector<1x12x12xf32>
    %14 = vector.shape_cast %13 : vector<1x12x12xf32> to vector<12x12xf32>
    %15 = vector.shape_cast %12 : vector<12x12xf32> to vector<1x12x12xf32>
    tpu.vector_store %arg4[%c1_14, %c0_15, %c0_16], %15 {strides = array<i32>} : memref<2x12x12xf32, #tpu.memory_space<vmem>>, vector<1x12x12xf32>,
    return
  }
  func.func @transform_0(%arg0: i32) -> (i32, i32) {
    %c0_i32 = arith.constant 0 : i32
    %c0_i32_0 = arith.constant 0 : i32
    %c0_i32_1 = arith.constant 0 : i32
    return %c0_i32, %c0_i32_0 : i32, i32
  }
  func.func @transform_1(%arg0: i32) -> (i32, i32) {
    %c0_i32 = arith.constant 0 : i32
    %c0_i32_0 = arith.constant 0 : i32
    %c0_i32_1 = arith.constant 0 : i32
    return %c0_i32, %c0_i32_0 : i32, i32
  }
  func.func @transform_2(%arg0: i32) -> (i32, i32, i32) {
    %c0_i32 = arith.constant 0 : i32
    %c0_i32_0 = arith.constant 0 : i32
    %c0_i32_1 = arith.constant 0 : i32
    return %arg0, %c0_i32, %c0_i32_0 : i32, i32, i32
  }
  func.func @transform_3(%arg0: i32) -> (i32, i32, i32) {
    %c0_i32 = arith.constant 0 : i32
    %c0_i32_0 = arith.constant 0 : i32
    %c0_i32_1 = arith.constant 0 : i32
    return %arg0, %c0_i32, %c0_i32_0 : i32, i32, i32
  }
}

</mosaic_0001>

<bundles_post_ra>
// kernel: tpu_custom_call.1
= control target key start
LH: loop header
LB: loop body
LE: loop exit
PB: predicated region body
PF: predicated region fallthrough
CT: control target
= control target key end

     0   :  { %8 = vsyncpa [#allocation3], 0  ;;  %s1147_s0 = inlined_call_operand.hbm [shape: f32[12,16], index: 0, kind: input, shape index: {}]   ;;  %s1148_s1 = inlined_call_operand.hbm [shape: f32[16,12], index: 1, kind: input, shape index: {}]   ;;  %s1149_s2 = inlined_call_operand.hbm [shape: f32[8,16,16], index: 2, kind: input, shape index: {}]   ;;  %s1150_s3 = inlined_call_operand.vmem [shape: f32[8,12,12], index: 3, kind: output, shape index: {}]  }
   0x1   :  { %9 = vsyncpa [#allocation5], 0  ;;  %s957_s12 = smov 0   ;;  %s959_s13 = smov 0  }
   0x2   :  { %s961_s14 = smov 0   ;;  %s963_s15 = smov 0  }
   0x3 LB: > { %s976_s16 = sadd.s32 4294967295, %s930_s15   ;;  %s979_s17 = sadd.s32 1, %s930_s15   ;;  %s930_s15 = sphi %s963_s15, %s1169_s15   ;;  %s926_s14 = sphi %s961_s14, %s1168_s14   ;;  %s922_s13 = sphi %s959_s13, %s1167_s13   ;;  %s918_s12 = sphi %s957_s12, %s1166_s12  }
   0x4   : > { %s61_s18 = ssub.s32 %s930_s15, %s979_s17  ;;  %s64_s19 = sadd.s32 1, %s926_s14 }
   0x5   : > { %p62_p0 = scmp.eq.s32.totalorder %s61_s18, 0  ;;  %p71_p1 = scmp.ne.s32.totalorder %s926_s14, %s922_s13 }
   0x6   : > { %p72_p2 = scmp.eq.s32.totalorder %s930_s15, 0  ;;  %p77_p3 = scmp.ne.s32.totalorder %s922_s13, %s918_s12 }
   0x7   : > { %s989_s20 = scalar_select %p62_p0, %s926_s14, %s64_s19  }
   0x8   : > { %p73_p4 = por %p72_p2, %p71_p1  ;;  %p1151_p5 = scmp.eq.s32.totalorder %s976_s16, 0 }
   0x9   : > { %p648_p6 = scmp.ge.s32.totalorder %s930_s15, 1  ;;  %p114_p7 = scmp.lt.s32.totalorder %s930_s15, 5 }
   0xa   : > { %p996_p8 = por %p1151_p5, %p77_p3  ;;  %s932_s23 = smov [#allocation2]  }
   0xb   : > { %p1000_p9 = pnand %p648_p6, %p114_p7  ;;  %s126_s24 = sshll.u32 %s932_s23, 4  ;;  %s127_s24 = int_to_ptr.vmem [resolvable:$true] %s126_s24 }
   0xc   : > { %s1155_s21 = scalar_select %p996_p8, 1, 0 }
   0xd   : > { %s1156_s22 = scalar_select %p1000_p9, 1, 0 }
   0xe   : > { %p750_p10 = pneg %p1000_p9  ;;  %p763_p12 = scmp.lt.s32.totalorder %s930_s15, 4 }
   0xf   : > { %s802_s29 = scalar_lea.hbm %s1147_s0, 256 }
  0x10   : > { %p1008_p11 = pnand %p750_p10, %p1151_p5  ;;  %p1013_p13 = pnand %p763_p12, %p73_p4 }
  0x11   : > { %p803_p0 = scmp.ne.s32.totalorder %s1147_s0, %s802_s29  ;;  %p809_p4 = scmp.lt.u32.totalorder %s802_s29, %s1147_s0 }
  0x12   : > { %s1158_s26 = scalar_select %p1013_p13, 1, 0 }
  0x13   : > { %p804_p1 = pneg %p1008_p11 }
  0x15   : > { %p805_p2 = pnand %p804_p1, %p803_p0 }
  0x17   : > { %p806_p3 = pneg %p805_p2 }
  0x19   : > { %p811_p6 = pnand %p809_p4, %p806_p3 }
  0x1b   : > { %814 = shalt.err (!%p811_p6)
}
  0x1c   : > { %s815_s7 = scalar_lea.vmem %s127_s24, 256  ;;  %p823_p5 = scmp.lt.s32.totalorder %s127_s24, %s127_s24 }
  0x1d   : > { %p816_p7 = scmp.ne.s32.totalorder %s127_s24, %s815_s7  ;;  %p824_p8 = scmp.lt.s32.totalorder %s815_s7, %s815_s7 }
  0x1f   : > { %p818_p10 = pnand %p816_p7, %p804_p1  ;;  %p825_p9 = por %p824_p8, %p823_p5 }
  0x21   : > { %p819_p12 = pneg %p818_p10 }
  0x23   : > { %p826_p13 = pnand %p825_p9, %p819_p12 }
  0x25   : > { %829 = shalt.err (!%p826_p13)
}
  0x26   : > { %s933_s8 = smov 128   ;;  %s934_s9 = smov 8  }
  0x27   : > { %753 = dma.hbm_to_vmem [thread:$0]  (!%p1008_p11), %s1147_s0, 256, %s127_s24, [#allocation3], %s933_s8, %s933_s8, %s934_s9  }
  0x28   : > { %s935_s12 = smov [#allocation4]   ;;  %s153_s19 = sand.u32 1, %s930_s15  }
  0x29   : > { %s139_s18 = sshll.u32 %s935_s12, 4  ;;  %s830_s28 = scalar_lea.hbm %s1148_s1, 256  ;;  %s140_s18 = int_to_ptr.vmem [resolvable:$true] %s139_s18 }
  0x2a   : > { %p831_p5 = scmp.ne.s32.totalorder %s1148_s1, %s830_s28  ;;  %p837_p13 = scmp.lt.u32.totalorder %s830_s28, %s1148_s1 }
  0x2c   : > { %p833_p8 = pnand %p831_p5, %p804_p1 }
  0x2e   : > { %p834_p9 = pneg %p833_p8 }
  0x30   : > { %p839_p0 = pnand %p837_p13, %p834_p9 }
  0x32   : > { %842 = shalt.err (!%p839_p0)
}
  0x33   : > { %s843_s24 = scalar_lea.vmem %s140_s18, 256  ;;  %p851_p6 = scmp.lt.s32.totalorder %s140_s18, %s140_s18 }
  0x34   : > { %p844_p2 = scmp.ne.s32.totalorder %s140_s18, %s843_s24  ;;  %p852_p7 = scmp.lt.s32.totalorder %s843_s24, %s843_s24 }
  0x36   : > { %p846_p3 = pnand %p844_p2, %p804_p1  ;;  %p853_p10 = por %p852_p7, %p851_p6 }
  0x38   : > { %p847_p4 = pneg %p846_p3 }
  0x3a   : > { %p854_p12 = pnand %p853_p10, %p847_p4 }
  0x3c   : > { %857 = shalt.err (!%p854_p12)
}
  0x3d   : > { %756 = dma.hbm_to_vmem [thread:$0]  (!%p1008_p11), %s1148_s1, 256, %s140_s18, [#allocation5], %s933_s8, %s933_s8, %s934_s9  }
  0x3e   : > { %s155_s10 = sand.u32 1, %s926_s14   ;;  %s678_s11 = sshll.u32 %s930_s15, 9 }
  0x3f   : > { %s652_s12 = sshll.u32 %s155_s10, 5  ;;  %s1071_s28 = scalar_lea.hbm %s1149_s2, %s678_s11 }
  0x40   : > { %s157_s25 = scalar_lea.vmem [#allocation6], %s652_s12  ;;  %s1075_s30 = scalar_lea.sflag [#allocation3], %s153_s19 }
  0x41   : > { %s165_s29 = sshll.u32 %s157_s25, 4  ;;  %s858_s4 = scalar_lea.hbm %s1071_s28, 512  ;;  %s1073_s29 = int_to_ptr.vmem [resolvable:$true] %s165_s29 }
  0x42   : > { %p859_p11 = scmp.ne.s32.totalorder %s1071_s28, %s858_s4  ;;  %p1159_p1 = scmp.ne.s32.totalorder %s1158_s26, 0 }
  0x43   : > { %s863_s5 = scalar_lea.hbm %s1149_s2, 2048  ;;  %p864_p13 = scmp.lt.u32.totalorder %s1071_s28, %s1149_s2 }
  0x44   : > { %p860_p5 = pneg %p1159_p1  ;;  %p865_p0 = scmp.lt.u32.totalorder %s863_s5, %s858_s4 }
  0x45   : > { %p867_p3 = scmp.lt.u32.totalorder %s858_s4, %s1071_s28 }
  0x46   : > { %p861_p8 = pnand %p860_p5, %p859_p11  ;;  %p866_p2 = por %p865_p0, %p864_p13 }
  0x48   : > { %p862_p9 = pneg %p861_p8  ;;  %p868_p4 = por %p867_p3, %p866_p2 }
  0x4a   : > { %p869_p6 = pnand %p868_p4, %p862_p9 }
  0x4c   : > { %872 = shalt.err (!%p869_p6)
}
  0x4d   : > { %s873_s19 = scalar_lea.vmem %s1073_s29, 512  ;;  %s936_s7 = smov [#allocation6]  }
  0x4e   : > { %p874_p7 = scmp.ne.s32.totalorder %s1073_s29, %s873_s19  ;;  %s878_s10 = sshll.u32 %s936_s7, 4  ;;  %s879_s10 = int_to_ptr.vmem [resolvable:$false] %s878_s10 }
  0x4f   : > { %s880_s11 = scalar_lea.vmem %s879_s10, 1024  ;;  %p881_p11 = scmp.lt.s32.totalorder %s1073_s29, %s879_s10 }
  0x50   : > { %p876_p10 = pnand %p874_p7, %p860_p5  ;;  %p882_p8 = scmp.lt.s32.totalorder %s880_s11, %s873_s19 }
  0x52   : > { %p877_p12 = pneg %p876_p10  ;;  %p883_p13 = por %p882_p8, %p881_p11 }
  0x54   : > { %p884_p0 = pnand %p883_p13, %p877_p12 }
  0x56   : > { %887 = shalt.err (!%p884_p0)
}
  0x57   : > { %760 = dma.hbm_to_vmem [thread:$0]  (!%p1159_p1), %s1071_s28, 512, %s1073_s29, %s1075_s30, %s933_s8, %s933_s8, %s934_s9  }
  0x58   : > { %p1160_p5 = scmp.ne.s32.totalorder %s1156_s22, 0 }
  0x59   : > { %p1161_p9 = scmp.eq.s32.totalorder (!%p1160_p5), %s976_s16, 0 }
  0x5a   : > { %177 = sbr.rel (%p1160_p5) target bundleno = 546 (0x222), region = 32 }
  0x61   : > { %905 = dma.done.wait (%p1161_p9), [#allocation3], 256   ;;  %p1162_p2 = pmov %p1161_p9 }
  0x63   : > { %907 = vsyncadd (%p1162_p2), [#allocation3], 4294967040  ;;  %p1163_p3 = pmov %p1162_p2 }
  0x64   : > { %p1164_p4 = pmov %p1162_p2 }
  0x65   : > { %909 = dma.done.wait (%p1163_p3), [#allocation5], 256  }
  0x66   : > { %911 = vsyncadd (%p1164_p4), [#allocation5], 4294967040  ;;  %s187_s26 = sand.u32 1, %s976_s16   ;;  %s189_s8 = sand.u32 1, %s922_s13  }
  0x67   : > { %s659_s9 = sshll.u32 %s189_s8, 5  ;;  %s188_s22 = scalar_lea.sflag [#allocation3], %s187_s26 }
  0x68   : > { %s191_s12 = scalar_lea.vmem [#allocation6], %s659_s9  ;;  %p1165_p1 = scmp.ne.s32.totalorder %s1155_s21, 0 }
  0x6a   : > { %913 = dma.done.wait (%p1165_p1), %s188_s22, 512  }
  0x6b   : > { %915 = vsyncadd (%p1165_p1), %s188_s22, 4294966784  ;;  %vm229_vm0 = vcmask 130048   ;;  %v227_v0 = vld [vmem:[%s191_s12] sm:$0xff]  ;;  %v228_v1 = vld [vmem:[%s191_s12 + $0x8] sm:$0xff]  ;;  %s660_s21 = sshll.u32 %s976_s16, 1  ;;  %vm394_vm1 = vcmask 93184  }
  0x6c   : > { %v223_v2 = vld [vmem:[#allocation2] sm:$0xff]  ;;  %v724_v3 = vpack.c.bf16 %v228_v1, %v227_v0  ;;  %v667_v4 = vld [vmem:[%s191_s12 + $0x10] sm:$0xff]  ;;  %v668_v5 = vld [vmem:[%s191_s12 + $0x18] sm:$0xff]  ;;  %p217_p6 = scmp.lt.s32.totalorder %s660_s21, 7  ;;  %vm392_vm2 = vcmask 97280  }
  0x6d   : > { %700 = vmatprep.mubr.msk.f32.mxu0 %vm229_vm0, %v223_v2  ;;  %v732_v6 = vpack.c.bf16 %v668_v5, %v667_v4  ;;  %v225_v7 = vld [vmem:[#allocation4] sm:$0xff]  ;;  %v226_v8 = vld [vmem:[#allocation4 + $0x8] sm:$0xff]  ;;  %v224_v10 = vld [vmem:[#allocation2 + $0x8] sm:$0xf] }
  0x6e   : > { %725 = vmatprep.subr.bf16.mxu0 %v724_v3  ;;  %v728_v9 = vpack.c.bf16 %v226_v8, %v225_v7  ;;  %s1171_s21 = smov (!%p217_p6, %s660_s21), 7 }
  0x6f   : > { %727 = vmatpush3.bf16.msra.mxu0 %v724_v3  ;;  %s679_s23 = sshll.u32 %s1171_s21, 4 }
  0x70   : > { %733 = vmatprep.subr.bf16.mxu0 %v732_v6  ;;  %729 = vmatprep.subr.bf16.mxu1 %v728_v9  ;;  %s221_s25 = scalar_lea.vmem %s1150_s3, %s679_s23 }
  0x71   : > { %731 = vmatpush3.bf16.msra.mxu1 %v728_v9 }
  0x72   : > { %701 = vmatmul.mubr.msk.f32.vlgmr.msra.gmra.mrb[0].mxu0 %vm229_vm0, %v224_v10  ;;  %737 = vmatprep.subr.bf16.mxu1 %v728_v9 }
  0x73   : > { %735 = vmatpush3.bf16.msra.mxu0 %v732_v6  ;;  %714 = vmatprep.mubr.msk.f32.mxu0 %vm229_vm0, %v223_v2 }
  0x76   : > { %715 = vmatmul.mubr.msk.f32.vlgmr.msra.gmra.mrb[2].mxu0 %vm229_vm0, %v224_v10 }
 0x145   : > { %v702_v11 = vpop.f32.mrb[0].mxu0 }
 0x146   : > { %v302_v12 = vpop.f32.mrb[1].mxu0 }
 0x147   : > { %707 = vmatprep.mubr.msk.f32.mxu1 %vm229_vm0, %v302_v12 }
 0x148   : > { %708 = vmatmul.mubr.msk.f32.vlgmr.msra.gmra.mrb[0].mxu1 %vm229_vm0, %v702_v11 }
 0x149   : > { %v716_v13 = vpop.f32.mrb[2].mxu0  ;;  %739 = vmatpush3.bf16.msra.mxu1 %v728_v9 }
 0x14a   : > { %v465_v14 = vpop.f32.mrb[3].mxu0 }
 0x14b   : > { %721 = vmatprep.mubr.msk.f32.mxu1 %vm229_vm0, %v465_v14 }
 0x14c   : > { %722 = vmatmul.mubr.msk.f32.vlgmr.msra.gmra.mrb[2].mxu1 %vm229_vm0, %v716_v13 }
 0x21b   : > { %v709_v15 = vpop.f32.mrb[0].mxu1 }
 0x21c   : > { %395 = vst.msk [vmem:[%s221_s25 + $0x8] sm:$0xf] %vm394_vm1, %v709_v15  ;;  %v383_v16 = vpop.f32.mrb[1].mxu1 }
 0x21d   : > { %393 = vst.msk [vmem:[%s221_s25] sm:$0xff] %vm392_vm2, %v383_v16 }
 0x21f   : > { %v723_v17 = vpop.f32.mrb[2].mxu1 }
 0x220   : > { %674 = vst.msk [vmem:[%s221_s25 + $0x18] sm:$0xf] %vm394_vm1, %v723_v17  ;;  %v546_v18 = vpop.f32.mrb[3].mxu1 }
 0x221   : > { %673 = vst.msk [vmem:[%s221_s25 + $0x10] sm:$0xff] %vm392_vm2, %v546_v18 }
 0x222 PF: > { %p12_p7 = scmp.ge.s32.totalorder %s979_s17, 6   ;;  %s1166_s12 = smov %s922_s13 }
 0x223   : > { %s1167_s13 = smov %s926_s14  ;;  %s1168_s14 = smov %s989_s20 }
 0x224   : > { %s1169_s15 = smov %s979_s17  ;;  %14 = sbr.rel (!%p12_p7) target bundleno = 3 (0x3), region = 81 }
 0x22b   :  { %582 = vsyncpa [#allocation3], 1 }
 0x22c   :  { %584 = vsyncpa [#allocation3 + $0x1], 1 }
 0x22d   :  { %585 = vsyncpa [#allocation5], 1 }

</bundles_post_ra>
